<compile_context>
chip_gen: v7x
topology: tpu7x:2x2x1
jax: 0.10.0
libtpu: 0.0.40
codegen_flags: <defaults>
</compile_context>

<pallas_src>
import functools

import jax
import jax.numpy as jnp
from jax.experimental import pallas as pl
from jax.experimental.pallas import tpu as pltpu

_LANE = 128   # vreg lane width  -> feature dims padded to multiples of this
_SUB = 8      # vreg sublane     -> time dims padded to multiples of this


def _rup(x, m):
    return (x + m - 1) // m * m


def _pad2(x, rows, cols):
    r, c = x.shape
    return jnp.pad(x, ((0, rows - r), (0, cols - c)))


# ----------------------------- fused Pallas kernel --------------------------

def _fused_kernel(B, T_enc, T_enc_p, T_dec_p, nb, Hp, Op,
                  enc_ref, dec_ref, w_in_ref, w_out_ref, bias_ref,
                  out_ref, ctx_ref):
    """Fused encoder -> init_state -> decoder forward.

    enc_ref : (B*T_enc_p, Dp) bf16   full, VMEM-resident across grid steps
    dec_ref : (nb*T_dec_p, Dp) bf16  one decoder row block per grid step
    w_in_ref: (Dp, 2*Hp)      bf16   [We | W1x]
    w_out_ref:(Hp, Hp+Op)     bf16   [W1c | W2]
    bias_ref: (1, 2*Hp+Op)    f32    [be | b1 | b2]
    out_ref : (nb*T_dec_p, Op) f32
    ctx_ref : (B, Hp) f32 scratch    ctx @ W1c + b1, persists across steps
    """
    i = pl.program_id(0)

    we = w_in_ref[:, :Hp]
    w1x = w_in_ref[:, Hp:]
    w1c = w_out_ref[:, :Hp]
    w2 = w_out_ref[:, Hp:]
    be = bias_ref[:, :Hp]
    b1 = bias_ref[:, Hp:2 * Hp]
    b2 = bias_ref[:, 2 * Hp:]

    # -------- encoder + decoder.init_state (once per pallas_call) ----------
    @pl.when(i == 0)
    def _():
        h = jnp.tanh(
            jnp.dot(enc_ref[...], we, preferred_element_type=jnp.float32)
            + be)                                           # (B*T_enc_p, Hp)
        h = h.reshape(B, T_enc_p, Hp)
        if T_enc_p != T_enc:
            # Mask zero-padded time steps out of the mean (tanh(be) != 0).
            t = jax.lax.broadcasted_iota(jnp.int32, (1, T_enc_p, 1), 1)
            h = jnp.where(t < T_enc, h, 0.0)
        ctx = jnp.sum(h, axis=1) * (1.0 / T_enc)            # (B, Hp) f32
        # init_state(enc_outputs) == ctx; hoist ctx @ W1c and fold b1 in.
        ctx_ref[...] = (
            jnp.dot(ctx.astype(jnp.bfloat16), w1c,
                    preferred_element_type=jnp.float32) + b1)

    # -------- decoder on this row block -------------------------------------
    a = jnp.dot(dec_ref[...], w1x,
                preferred_element_type=jnp.float32)          # (nb*T_dec_p, Hp)
    ctxp = ctx_ref[pl.ds(i * nb, nb), :]                     # (nb, Hp)
    a = a.reshape(nb, T_dec_p, Hp) + ctxp[:, None, :]
    h_dec = jnp.tanh(a).reshape(nb * T_dec_p, Hp).astype(jnp.bfloat16)
    out_ref[...] = (
        jnp.dot(h_dec, w2, preferred_element_type=jnp.float32) + b2)


# ------------------------- one-time parameter packing -----------------------

def prepare_params(params):
    """Pad / pack / cast parameters ONCE; cache and reuse across forwards."""
    D, H = params["w_e"].shape
    O = params["w2"].shape[1]
    Dp, Hp, Op = _rup(D, _LANE), _rup(H, _LANE), _rup(O, _LANE)
    f32 = jnp.float32

    we = _pad2(params["w_e"].astype(f32), Dp, Hp)
    w1x = _pad2(params["w1x"].astype(f32), Dp, Hp)
    w1c = _pad2(params["w1c"].astype(f32), Hp, Hp)
    w2 = _pad2(params["w2"].astype(f32), Hp, Op)
    be = _pad2(params["b_e"].astype(f32), 1, Hp)
    b1 = _pad2(params["b1"].astype(f32), 1, Hp)
    b2 = _pad2(params["b2"].astype(f32), 1, Op)

    return {
        "w_in": jnp.concatenate([we, w1x], axis=1).astype(jnp.bfloat16),
        "w_out": jnp.concatenate([w1c, w2], axis=1).astype(jnp.bfloat16),
        "bias": jnp.concatenate([be, b1, b2], axis=1),   # f32
    }


# --------------------------------- wrapper ----------------------------------

def decoder_init_state(enc_outputs):
    # Matches the abstract contract: init_state(enc_outputs, *args) -> state.
    return enc_outputs


def encoder_decoder_forward(enc_X, dec_X, packed, *, out_features):
    """forward(enc_X, dec_X): encoder -> init_state -> decoder (one kernel)."""
    B, T_enc, D = enc_X.shape
    Bd, T_dec, Dd = dec_X.shape
    assert (B, D) == (Bd, Dd)

    Dp = packed["w_in"].shape[0]
    Hp = packed["w_in"].shape[1] // 2
    Op = packed["w_out"].shape[1] - Hp
    O = out_features

    T_enc_p = _rup(T_enc, _SUB)
    T_dec_p = _rup(T_dec, _SUB)

    # Row-pad time, lane-pad features, flatten (B,T)->rows, cast to bf16
    # (halves activation DMA bytes; matmuls accumulate in f32).
    def prep(x, Tp):
        Bx, Tx, Dx = x.shape
        x = jnp.pad(x, ((0, 0), (0, Tp - Tx), (0, Dp - Dx)))
        return x.reshape(Bx * Tp, Dp).astype(jnp.bfloat16)

    enc_flat = prep(enc_X, T_enc_p)
    dec_flat = prep(dec_X, T_dec_p)

    # 1-D grid over decoder-batch blocks: nb whole batches (nb*T_dec_p rows)
    # per step, chosen so blocks stay a few hundred rows at scale.  For the
    # toy shapes this is a single grid step (whole problem in one block).
    rows_target = 512
    nb = 1
    for cand in range(B, 0, -1):
        if B % cand == 0 and cand * T_dec_p <= max(rows_target, T_dec_p):
            nb = cand
            break
    n_steps = B // nb

    kernel = functools.partial(
        _fused_kernel, B, T_enc, T_enc_p, T_dec_p, nb, Hp, Op)

    flops = 2 * (B * T_enc_p * Dp * Hp + B * Hp * Hp
                 + B * T_dec_p * Dp * Hp + B * T_dec_p * Hp * Op)
    transcendentals = B * T_enc_p * Hp + B * T_dec_p * Hp
    bytes_accessed = (enc_flat.size * 2 + dec_flat.size * 2
                      + packed["w_in"].size * 2 + packed["w_out"].size * 2
                      + packed["bias"].size * 4
                      + B * T_dec_p * Op * 4)

    out_flat = pl.pallas_call(
        kernel,
        out_shape=jax.ShapeDtypeStruct((B * T_dec_p, Op), jnp.float32),
        grid_spec=pltpu.PrefetchScalarGridSpec(
            num_scalar_prefetch=0,
            grid=(n_steps,),
            in_specs=[
                # Encoder rows: full block, same index every step -> fetched
                # once, stays VMEM-resident.
                pl.BlockSpec((B * T_enc_p, Dp), lambda i: (0, 0)),
                # Decoder rows: streamed block per step (double-buffered).
                pl.BlockSpec((nb * T_dec_p, Dp), lambda i: (i, 0)),
                # Packed weights / biases: replicated (resident).
                pl.BlockSpec((Dp, 2 * Hp), lambda i: (0, 0)),
                pl.BlockSpec((Hp, Hp + Op), lambda i: (0, 0)),
                pl.BlockSpec((1, 2 * Hp + Op), lambda i: (0, 0)),
            ],
            out_specs=pl.BlockSpec((nb * T_dec_p, Op), lambda i: (i, 0)),
            scratch_shapes=[pltpu.VMEM((B, Hp), jnp.float32)],
        ),
        compiler_params=pltpu.CompilerParams(
            # Encoder (step 0) -> ctx scratch -> all later steps: the axis
            # carries a dependency, so it must be "arbitrary", not "parallel".
            dimension_semantics=("arbitrary",),
            # Conservative scoped-VMEM budget; valid on v7x (64 MiB physical).
            vmem_limit_bytes=32 * 1024 * 1024,
        ),
        cost_estimate=pl.CostEstimate(
            flops=flops,
            transcendentals=transcendentals,
            bytes_accessed=bytes_accessed,
        ),
    )(enc_flat, dec_flat, packed["w_in"], packed["w_out"], packed["bias"])

    # Strip row/lane padding back to the logical output shape.
    return out_flat.reshape(B, T_dec_p, Op)[:, :T_dec, :O]


# -------------------------------- reference ---------------------------------

def _reference(enc_X, dec_X, p):
    h = jnp.tanh(enc_X @ p["w_e"] + p["b_e"])          # (B, T, H)
    ctx = jnp.mean(h, axis=1)                           # (B, H)
    a = dec_X @ p["w1x"] + (ctx @ p["w1c"])[:, None, :] + p["b1"]
    hd = jnp.tanh(a)
    return hd @ p["w2"] + p["b2"]


# ----------------------------------- main ------------------------------------

if __name__ == "__main__":
    B, T_ENC, T_DEC, D_IN, H, O = 2, 8, 8, 32, 32, 32

    key = jax.random.PRNGKey(0)
    ks = jax.random.split(key, 8)
    enc_X = jax.random.normal(ks[0], (B, T_ENC, D_IN), jnp.float32)
    dec_X = jax.random.normal(ks[1], (B, T_DEC, D_IN), jnp.float32)

    params = {
        "w_e": 0.1 * jax.random.normal(ks[2], (D_IN, H), jnp.float32),
        "b_e": jnp.zeros((1, H), jnp.float32),
        "w1x": 0.1 * jax.random.normal(ks[3], (D_IN, H), jnp.float32),
        "w1c": 0.1 * jax.random.normal(ks[4], (H, H), jnp.float32),
        "b1": jnp.zeros((1, H), jnp.float32),
        "w2": 0.1 * jax.random.normal(ks[5], (H, O), jnp.float32),
        "b2": jnp.zeros((1, O), jnp.float32),
    }

    # One-time padding / packing / bf16 cast of the parameters (hoisted out of
    # the per-call forward path).
    packed = prepare_params(params)

    fwd = jax.jit(functools.partial(encoder_decoder_forward, out_features=O))
    out = jax.block_until_ready(fwd(enc_X, dec_X, packed))
    ref = _reference(enc_X, dec_X, params)

    assert out.shape == (B, T_DEC, O), out.shape
    # bf16 matmul operands (f32 accumulation) vs. pure-f32 reference:
    # expected max abs error ~1e-2 at these magnitudes; real bugs are O(1).
    err = float(jnp.max(jnp.abs(out - ref)))
    assert jnp.allclose(out, ref, atol=3e-2, rtol=3e-2), err
    print("KERNEL_OK")
</pallas_src>

<mosaic_0001>
module attributes {stable_mosaic.version = 11 : i64} {
  func.func @_fused_kernel(%arg0: i32, %arg1: memref<16x128xbf16, #tpu.memory_space<vmem>>, %arg2: memref<16x128xbf16, #tpu.memory_space<vmem>>, %arg3: memref<128x256xbf16, #tpu.memory_space<vmem>>, %arg4: memref<128x256xbf16, #tpu.memory_space<vmem>>, %arg5: memref<1x384xf32, #tpu.memory_space<vmem>>, %arg6: memref<16x128xf32, #tpu.memory_space<vmem>>, %arg7: memref<2x128xf32, #tpu.memory_space<vmem>>) attributes {dimension_semantics = [#tpu.dimension_semantics<arbitrary>], iteration_bounds = array<i64: 1>, scalar_prefetch = 0 : i64, scratch_operands = 1 : i64, tpu.core_type = #tpu.core_type<tc>, window_params = [{pipeline_mode = #tpu.pipeline_mode<synchronous>, transform_indices = @transform_0, window_bounds = array<i64: 16, 128>}, {transform_indices = @transform_1, window_bounds = array<i64: 16, 128>}, {pipeline_mode = #tpu.pipeline_mode<synchronous>, transform_indices = @transform_2, window_bounds = array<i64: 128, 256>}, {pipeline_mode = #tpu.pipeline_mode<synchronous>, transform_indices = @transform_3, window_bounds = array<i64: 128, 256>}, {pipeline_mode = #tpu.pipeline_mode<synchronous>, transform_indices = @transform_4, window_bounds = array<i64: 1, 384>}, {transform_indices = @transform_5, window_bounds = array<i64: 16, 128>}]} {
    %c0 = arith.constant 0 : index
    %c0_0 = arith.constant 0 : index
    %0 = vector.load %arg3[%c0, %c0_0] : memref<128x256xbf16, #tpu.memory_space<vmem>>, vector<128x128xbf16>
    %c0_1 = arith.constant 0 : index
    %c128 = arith.constant 128 : index
    %1 = vector.load %arg3[%c0_1, %c128] : memref<128x256xbf16, #tpu.memory_space<vmem>>, vector<128x128xbf16>
    %c0_2 = arith.constant 0 : index
    %c0_3 = arith.constant 0 : index
    %2 = vector.load %arg4[%c0_2, %c0_3] : memref<128x256xbf16, #tpu.memory_space<vmem>>, vector<128x128xbf16>
    %c0_4 = arith.constant 0 : index
    %c128_5 = arith.constant 128 : index
    %3 = vector.load %arg4[%c0_4, %c128_5] : memref<128x256xbf16, #tpu.memory_space<vmem>>, vector<128x128xbf16>
    %c0_6 = arith.constant 0 : index
    %c0_7 = arith.constant 0 : index
    %4 = vector.load %arg5[%c0_6, %c0_7] : memref<1x384xf32, #tpu.memory_space<vmem>>, vector<1x128xf32>
    %c0_8 = arith.constant 0 : index
    %c128_9 = arith.constant 128 : index
    %5 = vector.load %arg5[%c0_8, %c128_9] : memref<1x384xf32, #tpu.memory_space<vmem>>, vector<1x128xf32>
    %c0_10 = arith.constant 0 : index
    %c256 = arith.constant 256 : index
    %6 = vector.load %arg5[%c0_10, %c256] : memref<1x384xf32, #tpu.memory_space<vmem>>, vector<1x128xf32>
    %c0_i32 = arith.constant 0 : i32
    %7 = arith.cmpi eq, %arg0, %c0_i32 : i32
    %8 = arith.extui %7 : i1 to i32
    %c0_i32_11 = arith.constant 0 : i32
    %9 = arith.cmpi ne, %8, %c0_i32_11 : i32
    scf.if %9 {
      %c0_18 = arith.constant 0 : index
      %c0_19 = arith.constant 0 : index
      %26 = vector.load %arg1[%c0_18, %c0_19] : memref<16x128xbf16, #tpu.memory_space<vmem>>, vector<16x128xbf16>
      %cst_20 = arith.constant dense<0.000000e+00> : vector<16x128xf32>
      %27 = tpu.matmul %26, %0, %cst_20 {dimension_numbers = #tpu.dot_dimension_numbers<[1], [0], [0], [1], [0, 0, 1, 1], [], []>} : vector<16x128xbf16>, vector<128x128xbf16>, vector<16x128xf32> -> vector<16x128xf32>
      %28 = vector.broadcast %4 : vector<1x128xf32> to vector<16x128xf32>
      %29 = arith.addf %27, %28 : vector<16x128xf32>
      %30 = math.tanh %29 : vector<16x128xf32>
      %31 = vector.shape_cast %30 : vector<16x128xf32> to vector<2x8x128xf32>
      %cst_21 = arith.constant dense<0.000000e+00> : vector<2x128xf32>
      %32 = vector.multi_reduction <add>, %31, %cst_21 [1] : vector<2x8x128xf32> to vector<2x128xf32>
      %cst_22 = arith.constant 1.250000e-01 : f32
      %33 = vector.broadcast %cst_22 : f32 to vector<2x128xf32>
      %34 = arith.mulf %32, %33 : vector<2x128xf32>
      %35 = arith.truncf %34 : vector<2x128xf32> to vector<2x128xbf16>
      %cst_23 = arith.constant dense<0.000000e+00> : vector<2x128xf32>
      %36 = tpu.matmul %35, %2, %cst_23 {dimension_numbers = #tpu.dot_dimension_numbers<[1], [0], [0], [1], [0, 0, 1, 1], [], []>} : vector<2x128xbf16>, vector<128x128xbf16>, vector<2x128xf32> -> vector<2x128xf32>
      %37 = vector.broadcast %5 : vector<1x128xf32> to vector<2x128xf32>
      %38 = arith.addf %36, %37 : vector<2x128xf32>
      %c0_24 = arith.constant 0 : index
      %c0_25 = arith.constant 0 : index
      %39 = vector.load %arg7[%c0_24, %c0_25] : memref<2x128xf32, #tpu.memory_space<vmem>>, vector<2x128xf32>
      tpu.vector_store %arg7[%c0_24, %c0_25], %38 {strides = array<i32>} : memref<2x128xf32, #tpu.memory_space<vmem>>, vector<2x128xf32>,
    } else {
    }
    %c0_12 = arith.constant 0 : index
    %c0_13 = arith.constant 0 : index
    %10 = vector.load %arg2[%c0_12, %c0_13] : memref<16x128xbf16, #tpu.memory_space<vmem>>, vector<16x128xbf16>
    %cst = arith.constant dense<0.000000e+00> : vector<16x128xf32>
    %11 = tpu.matmul %10, %1, %cst {dimension_numbers = #tpu.dot_dimension_numbers<[1], [0], [0], [1], [0, 0, 1, 1], [], []>} : vector<16x128xbf16>, vector<128x128xbf16>, vector<16x128xf32> -> vector<16x128xf32>
    %c2_i32 = arith.constant 2 : i32
    %12 = arith.muli %arg0, %c2_i32 : i32
    %13 = arith.index_cast %12 : i32 to index
    %c0_14 = arith.constant 0 : index
    %14 = vector.load %arg7[%13, %c0_14] : memref<2x128xf32, #tpu.memory_space<vmem>>, vector<2x128xf32>
    %15 = vector.shape_cast %11 : vector<16x128xf32> to vector<2x8x128xf32>
    %16 = vector.shape_cast %14 : vector<2x128xf32> to vector<2x1x128xf32>
    %17 = vector.broadcast %16 : vector<2x1x128xf32> to vector<2x8x128xf32>
    %18 = arith.addf %15, %17 : vector<2x8x128xf32>
    %19 = math.tanh %18 : vector<2x8x128xf32>
    %20 = vector.shape_cast %19 : vector<2x8x128xf32> to vector<16x128xf32>
    %21 = arith.truncf %20 : vector<16x128xf32> to vector<16x128xbf16>
    %cst_15 = arith.constant dense<0.000000e+00> : vector<16x128xf32>
    %22 = tpu.matmul %21, %3, %cst_15 {dimension_numbers = #tpu.dot_dimension_numbers<[1], [0], [0], [1], [0, 0, 1, 1], [], []>} : vector<16x128xbf16>, vector<128x128xbf16>, vector<16x128xf32> -> vector<16x128xf32>
    %23 = vector.broadcast %6 : vector<1x128xf32> to vector<16x128xf32>
    %24 = arith.addf %22, %23 : vector<16x128xf32>
    %c0_16 = arith.constant 0 : index
    %c0_17 = arith.constant 0 : index
    %25 = vector.load %arg6[%c0_16, %c0_17] : memref<16x128xf32, #tpu.memory_space<vmem>>, vector<16x128xf32>
    tpu.vector_store %arg6[%c0_16, %c0_17], %24 {strides = array<i32>} : memref<16x128xf32, #tpu.memory_space<vmem>>, vector<16x128xf32>,
    return
  }
  func.func @transform_0(%arg0: i32) -> (i32, i32) {
    %c0_i32 = arith.constant 0 : i32
    %c0_i32_0 = arith.constant 0 : i32
    %c0_i32_1 = arith.constant 0 : i32
    return %c0_i32, %c0_i32_0 : i32, i32
  }
  func.func @transform_1(%arg0: i32) -> (i32, i32) {
    %c0_i32 = arith.constant 0 : i32
    %c0_i32_0 = arith.constant 0 : i32
    return %arg0, %c0_i32 : i32, i32
  }
  func.func @transform_2(%arg0: i32) -> (i32, i32) {
    %c0_i32 = arith.constant 0 : i32
    %c0_i32_0 = arith.constant 0 : i32
    %c0_i32_1 = arith.constant 0 : i32
    return %c0_i32, %c0_i32_0 : i32, i32
  }
  func.func @transform_3(%arg0: i32) -> (i32, i32) {
    %c0_i32 = arith.constant 0 : i32
    %c0_i32_0 = arith.constant 0 : i32
    %c0_i32_1 = arith.constant 0 : i32
    return %c0_i32, %c0_i32_0 : i32, i32
  }
  func.func @transform_4(%arg0: i32) -> (i32, i32) {
    %c0_i32 = arith.constant 0 : i32
    %c0_i32_0 = arith.constant 0 : i32
    %c0_i32_1 = arith.constant 0 : i32
    return %c0_i32, %c0_i32_0 : i32, i32
  }
  func.func @transform_5(%arg0: i32) -> (i32, i32) {
    %c0_i32 = arith.constant 0 : i32
    %c0_i32_0 = arith.constant 0 : i32
    return %arg0, %c0_i32 : i32, i32
  }
}

</mosaic_0001>

<bundles_post_ra>
// kernel: encoder_decoder_forward.1
= control target key start
LH: loop header
LB: loop body
LE: loop exit
PB: predicated region body
PF: predicated region fallthrough
CT: control target
= control target key end

     0   :  { %10 = vsyncpa [#allocation4], 0  ;;  %s1012_s0 = inlined_call_operand.vmem [shape: bf16[16,128], index: 0, kind: input, shape index: {}]   ;;  %s1013_s1 = inlined_call_operand.vmem [shape: bf16[16,128], index: 1, kind: input, shape index: {}]   ;;  %s1014_s2 = inlined_call_operand.hbm [shape: bf16[128,256], index: 2, kind: input, shape index: {}]   ;;  %s1015_s3 = inlined_call_operand.hbm [shape: bf16[128,256], index: 3, kind: input, shape index: {}]   ;;  %s1016_s4 = inlined_call_operand.vmem [shape: f32[1,384], index: 4, kind: input, shape index: {}]   ;;  %s1017_s5 = inlined_call_operand.hbm [shape: f32[16,128], index: 5, kind: output, shape index: {}]  }
   0x1   :  { %11 = vsyncpa [#allocation7], 0 }
   0x2   :  { %12 = vsyncpa [#allocation5], 0  ;;  %s874_s18 = smov [#allocation3]   ;;  %s802_s22 = scalar_lea.hbm %s1014_s2, 2048 }
   0x3   :  { %s22_s19 = sshll.u32 %s874_s18, 4  ;;  %p803_p0 = scmp.ne.s32.totalorder %s1014_s2, %s802_s22  ;;  %s23_s19 = int_to_ptr.vmem [resolvable:$true] %s22_s19 }
   0x4   :  { %p806_p1 = scmp.lt.u32.totalorder %s802_s22, %s1014_s2 }
   0x6   :  { %p808_p2 = pnand %p806_p1, %p803_p0 }
   0x8   :  { %811 = shalt.err (!%p808_p2)
}
   0x9   :  { %s812_s27 = scalar_lea.vmem %s23_s19, 2048  ;;  %p817_p4 = scmp.lt.s32.totalorder %s23_s19, %s23_s19 }
   0xa   :  { %p813_p3 = scmp.ne.s32.totalorder %s23_s19, %s812_s27  ;;  %p818_p5 = scmp.lt.s32.totalorder %s812_s27, %s812_s27 }
   0xc   :  { %p819_p6 = por %p818_p5, %p817_p4 }
   0xe   :  { %p820_p7 = pnand %p819_p6, %p813_p3 }
  0x10   :  { %823 = shalt.err (!%p820_p7)
}
  0x11   :  { %s875_s28 = smov 128   ;;  %s876_s29 = smov 8  }
  0x12   :  { %28 = dma.hbm_to_vmem [thread:$0]  %s1014_s2, 2048, %s23_s19, [#allocation4], %s875_s28, %s875_s28, %s876_s29  }
  0x13   :  { %s877_s7 = smov [#allocation6]   ;;  %s824_s11 = scalar_lea.hbm %s1015_s3, 2048 }
  0x14   :  { %s34_s8 = sshll.u32 %s877_s7, 4  ;;  %p825_p8 = scmp.ne.s32.totalorder %s1015_s3, %s824_s11  ;;  %s35_s8 = int_to_ptr.vmem [resolvable:$true] %s34_s8 }
  0x15   :  { %p828_p9 = scmp.lt.u32.totalorder %s824_s11, %s1015_s3 }
  0x17   :  { %p830_p10 = pnand %p828_p9, %p825_p8 }
  0x19   :  { %833 = shalt.err (!%p830_p10)
}
  0x1a   :  { %s834_s16 = scalar_lea.vmem %s35_s8, 2048  ;;  %p839_p12 = scmp.lt.s32.totalorder %s35_s8, %s35_s8 }
  0x1b   :  { %p835_p11 = scmp.ne.s32.totalorder %s35_s8, %s834_s16  ;;  %p840_p13 = scmp.lt.s32.totalorder %s834_s16, %s834_s16 }
  0x1d   :  { %p841_p0 = por %p840_p13, %p839_p12 }
  0x1f   :  { %p842_p1 = pnand %p841_p0, %p835_p11 }
  0x21   :  { %845 = shalt.err (!%p842_p1)
}
  0x22   :  { %40 = dma.hbm_to_vmem [thread:$0]  %s1015_s3, 2048, %s35_s8, [#allocation7], %s875_s28, %s875_s28, %s876_s29  }
  0x23   :  { %868 = dma.done.wait [#allocation4], 2048  }
  0x24   :  { %869 = vsyncadd [#allocation4], 4294965248 }
  0x25   :  { %870 = dma.done.wait [#allocation7], 2048  }
  0x26   :  { %871 = vsyncadd [#allocation7], 4294965248  ;;  %v878_v0 = vmov 0.0   ;;  %vm879_vm0 = vmmov 0   ;;  %v760_v1 = vld [vmem:[#allocation3] ss:$8 sps:$4 sm:$0xff]  }
  0x27   :  { %672 = vmatprep.subr.bf16.mxu0 %v878_v0  ;;  %688 = vmatprep.mubr.msk.bf16.mxu0 %vm879_vm0, %v878_v0  ;;  %v761_v2 = vld [vmem:[#allocation3 + $0x10] ss:$8 sps:$4 sm:$0xff]   ;;  %v762_v3 = vld [vmem:[#allocation3 + $0x20] ss:$8 sps:$4 sm:$0xff]   ;;  %v772_v13 = vld [vmem:[#allocation3 + $0x4] ss:$8 sps:$4 sm:$0xff]  }
  0x28   :  { %692 = vmatprep.subr.bf16.mxu1 %v878_v0  ;;  %708 = vmatprep.mubr.msk.bf16.mxu1 %vm879_vm0, %v878_v0  ;;  %v763_v4 = vld [vmem:[#allocation3 + $0x30] ss:$8 sps:$4 sm:$0xff]   ;;  %v764_v5 = vld [vmem:[#allocation3 + $0x40] ss:$8 sps:$4 sm:$0xff]   ;;  %v774_v15 = vld [vmem:[#allocation3 + $0x14] ss:$8 sps:$4 sm:$0xff]  }
  0x29   :  { %673 = vmatpush3.bf16.msra.mxu0 %v760_v1  ;;  %v765_v6 = vld [vmem:[#allocation3 + $0x50] ss:$8 sps:$4 sm:$0xff]   ;;  %v766_v7 = vld [vmem:[#allocation3 + $0x60] ss:$8 sps:$4 sm:$0xff]   ;;  %v776_v17 = vld [vmem:[#allocation3 + $0x24] ss:$8 sps:$4 sm:$0xff]  }
  0x2a   :  { %674 = vmatprep.subr.bf16.mxu0 %v878_v0  ;;  %v767_v8 = vld [vmem:[#allocation3 + $0x70] ss:$8 sps:$4 sm:$0xff]   ;;  %v768_v9 = vld [vmem:[%s1012_s0] sm:$0xff]   ;;  %vm252_vm1 = vcmask 1041409   ;;  %s881_s25 = smov [#allocation8]  }
  0x2b   :  { %v769_v10 = vld [vmem:[#allocation6] ss:$8 sps:$4 sm:$0xff]   ;;  %v770_v11 = vld [vmem:[#allocation6 + $0x10] ss:$8 sps:$4 sm:$0xff]   ;;  %v778_v19 = vld [vmem:[#allocation3 + $0x34] ss:$8 sps:$4 sm:$0xff]  }
  0x2c   :  { %693 = vmatpush3.bf16.msra.mxu1 %v769_v10  ;;  %v771_v12 = vld [vmem:[#allocation6 + $0x20] ss:$8 sps:$4 sm:$0xff]   ;;  %v773_v14 = vld [vmem:[#allocation6 + $0x30] ss:$8 sps:$4 sm:$0xff]   ;;  %v780_v21 = vld [vmem:[#allocation3 + $0x44] ss:$8 sps:$4 sm:$0xff]  }
  0x2d   :  { %675 = vmatpush3.bf16.msra.mxu0 %v761_v2  ;;  %694 = vmatprep.subr.bf16.mxu1 %v878_v0  ;;  %v775_v16 = vld [vmem:[#allocation6 + $0x40] ss:$8 sps:$4 sm:$0xff]   ;;  %v777_v18 = vld [vmem:[#allocation6 + $0x50] ss:$8 sps:$4 sm:$0xff]   ;;  %v782_v23 = vld [vmem:[#allocation3 + $0x54] ss:$8 sps:$4 sm:$0xff]  }
  0x2e   :  { %676 = vmatprep.subr.bf16.mxu0 %v878_v0  ;;  %v779_v20 = vld [vmem:[#allocation6 + $0x60] ss:$8 sps:$4 sm:$0xff]   ;;  %v781_v22 = vld [vmem:[#allocation6 + $0x70] ss:$8 sps:$4 sm:$0xff]   ;;  %v783_v24 = vld [vmem:[#allocation3 + $0x64] ss:$8 sps:$4 sm:$0xff]  }
  0x2f   :  { %v784_v25 = vld [vmem:[#allocation3 + $0x74] ss:$8 sps:$4 sm:$0xff]   ;;  %v786_v56 = vld [vmem:[#allocation6 + $0x4] ss:$8 sps:$4 sm:$0xff]   ;;  %s585_s26 = sshll.u32 %s881_s25, 4  ;;  %s586_s26 = int_to_ptr.vmem [resolvable:$true] %s585_s26 }
  0x30   :  { %695 = vmatpush3.bf16.msra.mxu1 %v770_v11  ;;  %v785_v26 = vld [vmem:[%s1013_s1] sm:$0xff]   ;;  %s846_s27 = scalar_lea.vmem %s586_s26, 256  ;;  %p851_p3 = scmp.lt.s32.totalorder %s586_s26, %s586_s26 }
  0x31   :  { %677 = vmatpush3.bf16.msra.mxu0 %v762_v3  ;;  %696 = vmatprep.subr.bf16.mxu1 %v878_v0  ;;  %v598_v27 = vld [vmem:[%s1016_s4] ss:$0 sm:$0xff]  ;;  %v788_v58 = vld [vmem:[#allocation6 + $0x24] ss:$8 sps:$4 sm:$0xff]   ;;  %p847_p2 = scmp.ne.s32.totalorder %s586_s26, %s846_s27  ;;  %p852_p4 = scmp.lt.s32.totalorder %s846_s27, %s846_s27 }
  0x32   :  { %678 = vmatprep.subr.bf16.mxu0 %v878_v0  ;;  %v787_v57 = vld [vmem:[#allocation6 + $0x14] ss:$8 sps:$4 sm:$0xff]   ;;  %v790_v1 = vld [vmem:[#allocation6 + $0x44] ss:$8 sps:$4 sm:$0xff]  }
  0x33   :  { %v789_v60 = vld [vmem:[#allocation6 + $0x34] ss:$8 sps:$4 sm:$0xff]   ;;  %v792_v3 = vld [vmem:[#allocation6 + $0x64] ss:$8 sps:$4 sm:$0xff]   ;;  %p853_p5 = por %p852_p4, %p851_p3 }
  0x34   :  { %697 = vmatpush3.bf16.msra.mxu1 %v771_v12  ;;  %v791_v2 = vld [vmem:[#allocation6 + $0x54] ss:$8 sps:$4 sm:$0xff]  }
  0x35   :  { %679 = vmatpush3.bf16.msra.mxu0 %v763_v4  ;;  %698 = vmatprep.subr.bf16.mxu1 %v878_v0  ;;  %v793_v4 = vld [vmem:[#allocation6 + $0x74] ss:$8 sps:$4 sm:$0xff]   ;;  %p854_p6 = pnand %p853_p5, %p847_p2 }
  0x36   :  { %680 = vmatprep.subr.bf16.mxu0 %v878_v0 }
  0x38   :  { %699 = vmatpush3.bf16.msra.mxu1 %v773_v14 }
  0x39   :  { %681 = vmatpush3.bf16.msra.mxu0 %v764_v5  ;;  %700 = vmatprep.subr.bf16.mxu1 %v878_v0  ;;  %v608_v5 = vld [vmem:[%s1016_s4 + $0x1] ss:$0 sm:$0xff] }
  0x3a   :  { %682 = vmatprep.subr.bf16.mxu0 %v878_v0 }
  0x3c   :  { %701 = vmatpush3.bf16.msra.mxu1 %v775_v16 }
  0x3d   :  { %683 = vmatpush3.bf16.msra.mxu0 %v765_v6  ;;  %702 = vmatprep.subr.bf16.mxu1 %v878_v0  ;;  %v880_v6 = vmov 1966171168  }
  0x3e   :  { %684 = vmatprep.subr.bf16.mxu0 %v878_v0 }
  0x40   :  { %703 = vmatpush3.bf16.msra.mxu1 %v777_v18 }
  0x41   :  { %685 = vmatpush3.bf16.msra.mxu0 %v766_v7  ;;  %704 = vmatprep.subr.bf16.mxu1 %v878_v0  ;;  %v455_v7 = vunpack.c.l.s4 %v880_v6 }
  0x42   :  { %686 = vmatprep.subr.bf16.mxu0 %v878_v0 }
  0x43   :  { %v456_v14 = vunpack.c.0.s8 %v455_v7 }
  0x44   :  { %705 = vmatpush3.bf16.msra.mxu1 %v779_v20 }
  0x45   :  { %687 = vmatpush3.bf16.msra.mxu0 %v767_v8  ;;  %706 = vmatprep.subr.bf16.mxu1 %v878_v0  ;;  %v457_v8 = vlaneseq }
  0x46   :  { %712 = vmatprep.subr.bf16.mxu0 %v878_v0 }
  0x48   :  { %689 = vmatmul.mubr.bf16.vlgmr.msra.gmra.mrb[0].mxu0 %v768_v9  ;;  %707 = vmatpush3.bf16.msra.mxu1 %v781_v22 }
  0x49   :  { %728 = vmatprep.mubr.msk.bf16.mxu0 %vm879_vm0, %v878_v0  ;;  %713 = vmatpush3.bf16.msra.mxu0 %v772_v13 }
  0x4a   :  { %714 = vmatprep.subr.bf16.mxu0 %v878_v0  ;;  %732 = vmatprep.subr.bf16.mxu1 %v878_v0 }
  0x4d   :  { %715 = vmatpush3.bf16.msra.mxu0 %v774_v15  ;;  %v458_v15 = vshrl.u32 %v457_v8, 7 }
  0x4e   :  { %716 = vmatprep.subr.bf16.mxu0 %v878_v0 }
  0x4f   :  { %v459_v16 = vsub.s32 %v456_v14, %v458_v15 }
  0x51   :  { %717 = vmatpush3.bf16.msra.mxu0 %v776_v17  ;;  %v470_v17 = vsub.s32 0, %v458_v15 }
  0x52   :  { %718 = vmatprep.subr.bf16.mxu0 %v878_v0 }
  0x55   :  { %719 = vmatpush3.bf16.msra.mxu0 %v778_v19 }
  0x56   :  { %720 = vmatprep.subr.bf16.mxu0 %v878_v0 }
  0x59   :  { %721 = vmatpush3.bf16.msra.mxu0 %v780_v21 }
  0x5a   :  { %722 = vmatprep.subr.bf16.mxu0 %v878_v0 }
  0x5d   :  { %723 = vmatpush3.bf16.msra.mxu0 %v782_v23 }
  0x5e   :  { %724 = vmatprep.subr.bf16.mxu0 %v878_v0 }
  0x61   :  { %725 = vmatpush3.bf16.msra.mxu0 %v783_v24 }
  0x62   :  { %726 = vmatprep.subr.bf16.mxu0 %v878_v0 }
  0x65   :  { %727 = vmatpush3.bf16.msra.mxu0 %v784_v25 }
  0x68   :  { %729 = vmatmul.mubr.bf16.vlgmr.msra.gmra.mrb[4].mxu0 %v785_v26 }
 0x11b   :  { %v217_v28 = vpop.f32.mrb[0].mxu0 }
 0x11c   :  { %v218_v29 = vadd.f32 %v598_v27, %v217_v28  ;;  %v690_v30 = vpop.f32.mrb[1].mxu0  ;;  %v627_v28 = vld [vmem:[%s1016_s4 + $0x2] ss:$0 sm:$0xff] }
 0x11d   :  { %v220_v31 = vpop.f32.mrb[2].mxu0 }
 0x11e   :  { %794 = vtanh.f32 %v218_v29  ;;  %v221_v32 = vadd.f32 %v598_v27, %v220_v31  ;;  %v691_v33 = vpop.f32.mrb[3].mxu0 }
 0x120   :  { %796 = vtanh.f32 %v221_v32 }
 0x128   :  { %v795_v34 = vpop.eup %794 }
 0x129   :  { %v226_v35 = vrot.slane %v795_v34, 4 }
 0x12a   :  { %v797_v36 = vpop.eup %796 }
 0x12b   :  { %v227_v37 = vadd.f32 %v795_v34, %v226_v35  ;;  %v232_v38 = vrot.slane %v797_v36, 4 }
 0x12d   :  { %v228_v39 = vrot.slane %v227_v37, 2  ;;  %v233_v40 = vadd.f32 %v797_v36, %v232_v38 }
 0x12f   :  { %v234_v41 = vrot.slane %v233_v40, 2  ;;  %v229_v42 = vadd.f32 %v228_v39, %v227_v37 }
 0x131   :  { %v230_v43 = vrot.slane %v229_v42, 1  ;;  %v235_v44 = vadd.f32 %v234_v41, %v233_v40 }
 0x133   :  { %v231_v45 = vadd.f32 %v230_v43, %v229_v42  ;;  %v236_v46 = vrot.slane %v235_v44, 1 }
 0x135   :  { %v237_v47 = vadd.f32 %v236_v46, %v235_v44  ;;  %v238_v48 = vmul.f32 0.125, %v231_v45 }
 0x137   :  { %v239_v49 = vmul.f32 0.125, %v237_v47  ;;  %v240_v50 = vpack.c.bf16 %v238_v48, %v238_v48 }
 0x139   :  { %v241_v51 = vpack.c.bf16 %v239_v49, %v239_v49  ;;  %v250_v52 = vunpack.c.l.b16 %v240_v50 }
 0x13b   :  { %v251_v53 = vunpack.c.l.b16 %v241_v51  ;;  %v435_v59 = vpop.f32.mrb[4].mxu0 }
 0x13c   :  { %v730_v61 = vpop.f32.mrb[5].mxu0 }
 0x13d   :  { %v253_v54 = vsel %vm252_vm1, %v251_v53, %v250_v52  ;;  %v438_v62 = vpop.f32.mrb[6].mxu0 }
 0x13e   :  { %v254_v55 = vpack.c.b16 %v253_v54, %v253_v54  ;;  %v731_v63 = vpop.f32.mrb[7].mxu0 }
 0x140   :  { %709 = vmatmul.mubr.bf16.vlgmr.msra.gmra.mrb[0].mxu1 %v254_v55 }
 0x141   :  { %748 = vmatprep.mubr.msk.bf16.mxu1 %vm879_vm0, %v878_v0  ;;  %733 = vmatpush3.bf16.msra.mxu1 %v786_v56 }
 0x142   :  { %734 = vmatprep.subr.bf16.mxu1 %v878_v0 }
 0x145   :  { %735 = vmatpush3.bf16.msra.mxu1 %v787_v57 }
 0x146   :  { %736 = vmatprep.subr.bf16.mxu1 %v878_v0 }
 0x149   :  { %737 = vmatpush3.bf16.msra.mxu1 %v788_v58 }
 0x14a   :  { %738 = vmatprep.subr.bf16.mxu1 %v878_v0 }
 0x14d   :  { %739 = vmatpush3.bf16.msra.mxu1 %v789_v60 }
 0x14e   :  { %740 = vmatprep.subr.bf16.mxu1 %v878_v0 }
 0x151   :  { %741 = vmatpush3.bf16.msra.mxu1 %v790_v1 }
 0x152   :  { %742 = vmatprep.subr.bf16.mxu1 %v878_v0 }
 0x155   :  { %743 = vmatpush3.bf16.msra.mxu1 %v791_v2 }
 0x156   :  { %744 = vmatprep.subr.bf16.mxu1 %v878_v0 }
 0x159   :  { %745 = vmatpush3.bf16.msra.mxu1 %v792_v3 }
 0x15a   :  { %746 = vmatprep.subr.bf16.mxu1 %v878_v0 }
 0x15d   :  { %747 = vmatpush3.bf16.msra.mxu1 %v793_v4 }
 0x213   :  { %v338_v9 = vpop.f32.mrb[0].mxu1 }
 0x214   :  { %v339_v10 = vadd.f32 %v608_v5, %v338_v9  ;;  %v710_v11 = vpop.f32.mrb[1].mxu1 }
 0x215   :  { %v341_v12 = vpop.f32.mrb[2].mxu1 }
 0x216   :  { %344 = vst [vmem:[#allocation2] sm:$0x3] %v339_v10  ;;  %v711_v13 = vpop.f32.mrb[3].mxu1 }
 0x21d   :  { %v626_v18 = vld.sshfl [vmem:[#allocation2] sm:$0x11 pattern:$0x75316420] }
 0x21e   :  { %v460_v0 = vrot.slane %v626_v18, %v459_v16  ;;  %v453_v19 = vcombine.high %v626_v18, %v626_v18 }
 0x220   :  { %v471_v20 = vrot.slane %v460_v0, %v470_v17  ;;  %v467_v21 = vrot.slane %v453_v19, %v459_v16 }
 0x222   :  { %v478_v22 = vadd.f32 %v471_v20, %v435_v59  ;;  %v475_v23 = vrot.slane %v467_v21, %v470_v17 }
 0x224   :  { %v479_v24 = vadd.f32 %v475_v23, %v438_v62  ;;  %798 = vtanh.f32 %v478_v22 }
 0x226   :  { %800 = vtanh.f32 %v479_v24 }
 0x22e   :  { %v799_v25 = vpop.eup %798 }
 0x230   :  { %v801_v26 = vpop.eup %800 }
 0x231   :  { %v482_v27 = vpack.c.bf16 %v801_v26, %v799_v25 }
 0x233   :  { %749 = vmatmul.mubr.bf16.vlgmr.msra.gmra.mrb[4].mxu1 %v482_v27 }
 0x306   :  { %v571_v29 = vpop.f32.mrb[4].mxu1 }
 0x307   :  { %v572_v30 = vadd.f32 %v627_v28, %v571_v29  ;;  %v750_v31 = vpop.f32.mrb[5].mxu1 }
 0x308   :  { %v574_v32 = vpop.f32.mrb[6].mxu1 }
 0x309   :  { %578 = vst [vmem:[#allocation8] sm:$0xff] %v572_v30  ;;  %v575_v33 = vadd.f32 %v627_v28, %v574_v32  ;;  %v751_v34 = vpop.f32.mrb[7].mxu1 }
 0x30b   :  { %579 = vst [vmem:[#allocation8 + $0x8] sm:$0xff] %v575_v33 }
 0x30c   :  { %857 = shalt.err (!%p854_p6)
}
 0x30d   :  { %s858_s6 = scalar_lea.hbm %s1017_s5, 256 }
 0x30e   :  { %p859_p7 = scmp.ne.s32.totalorder %s1017_s5, %s858_s6  ;;  %p862_p8 = scmp.lt.u32.totalorder %s858_s6, %s1017_s5 }
 0x310   :  { %p864_p9 = pnand %p862_p8, %p859_p7 }
 0x312   :  { %867 = shalt.err (!%p864_p9)
}
 0x313   :  { %591 = dma.vmem_to_hbm [thread:$0]  %s586_s26, 256, %s1017_s5, [#allocation5], %s875_s28, %s875_s28, %s876_s29  }
 0x314   :  { %872 = dma.done.wait [#allocation5], 256  }
 0x315   :  { %873 = vsyncadd [#allocation5], 4294967040 }
 0x316   :  { %595 = vsyncpa [#allocation4], 1 }
 0x317   :  { %596 = vsyncpa [#allocation7], 1 }
 0x318   :  { %597 = vsyncpa [#allocation5], 1 }

</bundles_post_ra>
